<compile_context>
chip_gen: v6e
topology: v6e:2x2x1
jax: 0.10.0
libtpu: 0.0.40
codegen_flags: <defaults>
</compile_context>

<pallas_src>
import functools

import jax
import jax.numpy as jnp
from jax.experimental import pallas as pl
from jax.experimental.pallas import tpu as pltpu

KERNEL_HEIGHTS = (3, 4, 5)


@functools.lru_cache(maxsize=None)
def _pltpu_roll_sign():
    """Probe pltpu.roll's rotation direction once with a tiny one-off kernel.

    Returns +1 if pltpu.roll matches np.roll (out[i] = in[i - shift]),
    -1 if it rotates the opposite way, 0 if roll is unavailable (then the
    kernel falls back to a concat-of-slices shift). Keeps the shift-add
    robust across jax versions; runs once and is cached.
    """
    try:
        def probe(x_ref, o_ref):
            o_ref[...] = pltpu.roll(x_ref[...], 1, 0)

        x = (jnp.arange(8 * 128, dtype=jnp.float32) + 1.0).reshape(8, 128)
        y = pl.pallas_call(
            probe, out_shape=jax.ShapeDtypeStruct((8, 128), jnp.float32)
        )(x)
        return 1 if bool(jnp.all(y[1] == x[0])) else -1
    except Exception:  # any lowering/runtime issue -> safe (slower) fallback
        return 0


def _shift_rows_up(s, k, n, roll_sign):
    """out[i, :] = s[(i + k) % n, :]. Wrapped / cross-sample rows are masked later."""
    if k == 0:
        return s
    if roll_sign == 1:        # pltpu.roll == np.roll semantics
        return pltpu.roll(s, n - k, 0)
    if roll_sign == -1:       # opposite rotation direction
        return pltpu.roll(s, k, 0)
    # fallback: explicit (unaligned) slices — correct, just slower
    return jnp.concatenate([s[k:], s[:k]], axis=0)


def ykcnn_kernel(emb_ref, wcat_ref, bcat_ref, mask_ref, fcw_ref, fcb_ref,
                 out_ref, *, TB, L, CH3, roll_sign):
    E = emb_ref.shape[2]
    KMAX = wcat_ref.shape[0]
    TBL = TB * L

    # (TB, L, E) -> (TB*L, E): one tall MXU operand for the whole batch tile.
    emb = emb_ref[...].reshape(TBL, E)                                  # bf16

    # Fused convolutions: one wide matmul per kernel-row offset k against the
    # channel-concatenated weight slab (E, 3C); shift the result up by k rows
    # (XLU roll, free slot) and accumulate in f32. Columns of group g are zero
    # for k >= K_g, so this reproduces all three Conv2d's at once.
    acc = jnp.zeros((TBL, CH3), jnp.float32)
    for k in range(KMAX):
        s = jnp.dot(emb, wcat_ref[k], preferred_element_type=jnp.float32)  # (TBL, 3C)
        acc = acc + _shift_rows_up(s, k, TBL, roll_sign)

    # bias + ReLU, then zero out rows outside each group's pool window
    # (t >= L - K_g, which also covers roll-wrap / neighbouring-sample rows).
    # Since act >= 0 after ReLU, a multiplicative 0/1 mask preserves the max.
    act = jnp.maximum(acc + bcat_ref[...], 0.0) * mask_ref[...]

    # Max-pool over time per sample: (TB*L, 3C) -> (TB, L, 3C) -> (TB, 3C).
    pooled = jnp.max(act.reshape(TB, L, CH3), axis=1)

    # FC head on the whole batch tile; output lanes padded to 128 so the store
    # is lane-dense (sliced back to O outside the kernel).
    logits = (jnp.dot(pooled.astype(jnp.bfloat16), fcw_ref[...],
                      preferred_element_type=jnp.float32)
              + fcb_ref[...])                                           # (TB, OPAD)
    out_ref[...] = logits.astype(out_ref.dtype)


def ykcnn_forward(x_tokens, params, *, L, E, C, O, TB=8):
    """Forward pass. TB = batch-tile per grid step (halve on v7x for large L/E)."""
    heights = KERNEL_HEIGHTS
    KMAX = max(heights)
    CH3 = C * len(heights)
    OPAD = max(128, ((O + 127) // 128) * 128)    # lane-dense padded FC output width
    B = x_tokens.shape[0]
    Bp = ((B + TB - 1) // TB) * TB               # pad batch to a multiple of TB
    grid_b = Bp // TB

    # ---- glue (XLA): embedding gather + one-time operand packing ------------
    # TODO(synk): fuse the embedding gather into the kernel (scalar-prefetched token
    # ids + DMA gather from the HBM table) to avoid materializing (B, L, E) in HBM;
    # kept in XLA here and cast to bf16 to halve the slab's HBM traffic.
    x_pad = jnp.zeros((Bp, L), x_tokens.dtype).at[:B].set(x_tokens)  # pad idx 0 rows
    emb = jnp.take(params["embedding"], x_pad, axis=0).astype(jnp.bfloat16)  # (Bp,L,E)

    # Fused conv weight: wcat[k, :, g*C:(g+1)*C] = w_{K_g}[k], zero when k >= K_g.
    wcat = jnp.zeros((KMAX, E, CH3), jnp.float32)
    for g, K in enumerate(heights):
        wcat = wcat.at[:K, :, g * C:(g + 1) * C].set(params[f"w{K}"])
    wcat = wcat.astype(jnp.bfloat16)
    bcat = jnp.concatenate([params[f"b{K}"] for K in heights], axis=-1)      # (1, 3C)

    # Valid-time mask per channel group: row r (time t = r mod L) valid iff t < L - K_g.
    t_idx = jnp.arange(TB * L, dtype=jnp.int32) % L
    limits = jnp.concatenate([jnp.full((C,), L - K, jnp.int32) for K in heights])
    mask = (t_idx[:, None] < limits[None, :]).astype(jnp.float32)            # (TB*L, 3C)

    # FC weights zero-padded to a 128-wide lane-dense output.
    fcw_pad = (jnp.zeros((CH3, OPAD), jnp.float32)
               .at[:, :O].set(params["fc_w"]).astype(jnp.bfloat16))
    fcb_pad = jnp.zeros((1, OPAD), jnp.float32).at[:, :O].set(params["fc_b"])

    roll_sign = _pltpu_roll_sign()
    kernel = functools.partial(ykcnn_kernel, TB=TB, L=L, CH3=CH3, roll_sign=roll_sign)

    out = pl.pallas_call(
        kernel,
        out_shape=jax.ShapeDtypeStruct((Bp, OPAD), jnp.float32),
        grid=(grid_b,),
        in_specs=[
            pl.BlockSpec((TB, L, E), lambda b: (b, 0, 0)),      # per-step batch tile
            pl.BlockSpec((KMAX, E, CH3), lambda b: (0, 0, 0)),  # resident fused conv W
            pl.BlockSpec((1, CH3), lambda b: (0, 0)),           # resident fused conv b
            pl.BlockSpec((TB * L, CH3), lambda b: (0, 0)),      # resident pool mask
            pl.BlockSpec((CH3, OPAD), lambda b: (0, 0)),        # resident FC W (padded)
            pl.BlockSpec((1, OPAD), lambda b: (0, 0)),          # resident FC b (padded)
        ],
        out_specs=pl.BlockSpec((TB, OPAD), lambda b: (b, 0)),   # lane-dense output slab
        compiler_params=pltpu.CompilerParams(
            dimension_semantics=("parallel",)),                 # megacore-shardable batch axis
    )(emb, wcat, bcat, mask, fcw_pad, fcb_pad)

    return out[:B, :O]  # (B, O) logits


def reference_forward(x_tokens, params, *, L, C):
    """Pure-JAX reference mirroring the PyTorch module (same bf16 operand rounding)."""
    hi = jax.lax.Precision.HIGHEST
    emb = jnp.take(params["embedding"], x_tokens, axis=0)
    emb = emb.astype(jnp.bfloat16).astype(jnp.float32)
    pooled = []
    for K in KERNEL_HEIGHTS:
        w = params[f"w{K}"].astype(jnp.bfloat16).astype(jnp.float32)
        b = params[f"b{K}"]
        T = L - K  # PyTorch MaxPool2d((L-K,1)) floor semantics drop the last conv row
        conv = jnp.zeros((emb.shape[0], T, C), jnp.float32)
        for k in range(K):
            conv = conv + jax.lax.dot_general(
                emb[:, k:k + T, :], w[k],
                dimension_numbers=(((2,), (0,)), ((), ())),
                precision=hi, preferred_element_type=jnp.float32)
        act = jnp.maximum(conv + b[None, :, :], 0.0)
        pooled.append(jnp.max(act, axis=1))
    feat = jnp.concatenate(pooled, axis=-1)
    feat = feat.astype(jnp.bfloat16).astype(jnp.float32)
    fcw = params["fc_w"].astype(jnp.bfloat16).astype(jnp.float32)
    return (jnp.dot(feat, fcw, precision=hi, preferred_element_type=jnp.float32)
            + params["fc_b"])


def init_params(key, *, V, E, C, O):
    ks = jax.random.split(key, 9)
    emb_table = 0.1 * jax.random.normal(ks[0], (V, E), jnp.float32)
    emb_table = emb_table.at[0].set(0.0)  # padding_idx = 0

    params = {"embedding": emb_table}
    for i, K in enumerate(KERNEL_HEIGHTS):
        fan_in = 1 * K * E
        bound = 1.0 / (fan_in ** 0.5)
        params[f"w{K}"] = jax.random.uniform(ks[1 + 2 * i], (K, E, C), jnp.float32,
                                             -bound, bound)
        params[f"b{K}"] = jax.random.uniform(ks[2 + 2 * i], (1, C), jnp.float32,
                                             -bound, bound)
    fc_in = C * len(KERNEL_HEIGHTS)
    fc_bound = 1.0 / (fc_in ** 0.5)
    params["fc_w"] = jax.random.uniform(ks[7], (fc_in, O), jnp.float32,
                                        -fc_bound, fc_bound)
    params["fc_b"] = jax.random.uniform(ks[8], (1, O), jnp.float32,
                                        -fc_bound, fc_bound)
    return params


if __name__ == "__main__":
    # small shapes consistent with the module; TB=8 -> grid=(2,) parallel batch tiles
    V = 50           # vocabulary_size
    L = 16           # max_seq_length
    E = 32           # embed_dim
    C = 16           # out_channels
    O = 2            # output_dims
    B = 16           # batch
    TB = 8           # batch tile per grid step (TB*L = 128 matmul rows)

    key = jax.random.PRNGKey(0)
    kp, kx = jax.random.split(key)
    params = init_params(kp, V=V, E=E, C=C, O=O)
    x_tokens = jax.random.randint(kx, (B, L), 0, V, dtype=jnp.int32)

    # TODO(synk): `Softmax` fc head class is not defined in the source snippet; with
    # hidden_dims=[] and dropout=0 it is modeled as a single Linear layer emitting
    # logits (softmax is only applied in predict(), not forward()).
    logits = ykcnn_forward(x_tokens, params, L=L, E=E, C=C, O=O, TB=TB)
    logits = jax.block_until_ready(logits)

    ref = reference_forward(x_tokens, params, L=L, C=C)
    assert logits.shape == (B, O)
    assert jnp.allclose(logits, ref, atol=2e-3, rtol=2e-3), (logits, ref)

    print("KERNEL_OK")
</pallas_src>

<mosaic_0001>
module attributes {stable_mosaic.version = 11 : i64} {
  func.func @probe(%arg0: memref<8x128xf32, #tpu.memory_space<vmem>>, %arg1: memref<8x128xf32, #tpu.memory_space<vmem>>) attributes {dimension_semantics = [], scalar_prefetch = 0 : i64, scratch_operands = 0 : i64, tpu.core_type = #tpu.core_type<tc>} {
    %c0 = arith.constant 0 : index
    %c0_0 = arith.constant 0 : index
    %0 = vector.load %arg0[%c0, %c0_0] : memref<8x128xf32, #tpu.memory_space<vmem>>, vector<8x128xf32>
    %c1_i32 = arith.constant 1 : i32
    %1 = tpu.dynamic_rotate %0 by %c1_i32 dim 0 : vector<8x128xf32>, i32 -> vector<8x128xf32>
    %c0_1 = arith.constant 0 : index
    %c0_2 = arith.constant 0 : index
    %2 = vector.load %arg1[%c0_1, %c0_2] : memref<8x128xf32, #tpu.memory_space<vmem>>, vector<8x128xf32>
    tpu.vector_store %arg1[%c0_1, %c0_2], %1 {strides = array<i32>} : memref<8x128xf32, #tpu.memory_space<vmem>>, vector<8x128xf32>,
    return
  }
}

module attributes {stable_mosaic.version = 11 : i64} {
  func.func @ykcnn_kernel(%arg0: i32, %arg1: memref<8x16x32xbf16, #tpu.memory_space<vmem>>, %arg2: memref<5x32x48xbf16, #tpu.memory_space<vmem>>, %arg3: memref<1x48xf32, #tpu.memory_space<vmem>>, %arg4: memref<128x48xf32, #tpu.memory_space<vmem>>, %arg5: memref<48x128xbf16, #tpu.memory_space<vmem>>, %arg6: memref<1x128xf32, #tpu.memory_space<vmem>>, %arg7: memref<8x128xf32, #tpu.memory_space<vmem>>) attributes {dimension_semantics = [#tpu.dimension_semantics<parallel>], iteration_bounds = array<i64: 2>, scalar_prefetch = 0 : i64, scratch_operands = 0 : i64, tpu.core_type = #tpu.core_type<tc>, window_params = [{transform_indices = @transform_0, window_bounds = array<i64: 8, 16, 32>}, {pipeline_mode = #tpu.pipeline_mode<synchronous>, transform_indices = @transform_1, window_bounds = array<i64: 5, 32, 48>}, {pipeline_mode = #tpu.pipeline_mode<synchronous>, transform_indices = @transform_2, window_bounds = array<i64: 1, 48>}, {pipeline_mode = #tpu.pipeline_mode<synchronous>, transform_indices = @transform_3, window_bounds = array<i64: 128, 48>}, {pipeline_mode = #tpu.pipeline_mode<synchronous>, transform_indices = @transform_4, window_bounds = array<i64: 48, 128>}, {pipeline_mode = #tpu.pipeline_mode<synchronous>, transform_indices = @transform_5, window_bounds = array<i64: 1, 128>}, {transform_indices = @transform_6, window_bounds = array<i64: 8, 128>}]} {
    %c0 = arith.constant 0 : index
    %c0_0 = arith.constant 0 : index
    %c0_1 = arith.constant 0 : index
    %0 = vector.load %arg1[%c0, %c0_0, %c0_1] : memref<8x16x32xbf16, #tpu.memory_space<vmem>>, vector<8x16x32xbf16>
    %1 = vector.shape_cast %0 : vector<8x16x32xbf16> to vector<128x32xbf16>
    %cst = arith.constant 0.000000e+00 : f32
    %2 = vector.broadcast %cst : f32 to vector<128x48xf32>
    %c0_2 = arith.constant 0 : index
    %c0_3 = arith.constant 0 : index
    %c0_4 = arith.constant 0 : index
    %3 = vector.load %arg2[%c0_2, %c0_3, %c0_4] : memref<5x32x48xbf16, #tpu.memory_space<vmem>>, vector<1x32x48xbf16>
    %4 = vector.shape_cast %3 : vector<1x32x48xbf16> to vector<32x48xbf16>
    %cst_5 = arith.constant dense<0.000000e+00> : vector<128x48xf32>
    %5 = tpu.matmul %1, %4, %cst_5 {dimension_numbers = #tpu.dot_dimension_numbers<[1], [0], [0], [1], [0, 0, 1, 1], [], []>} : vector<128x32xbf16>, vector<32x48xbf16>, vector<128x48xf32> -> vector<128x48xf32>
    %6 = arith.addf %2, %5 : vector<128x48xf32>
    %c1 = arith.constant 1 : index
    %c0_6 = arith.constant 0 : index
    %c0_7 = arith.constant 0 : index
    %7 = vector.load %arg2[%c1, %c0_6, %c0_7] : memref<5x32x48xbf16, #tpu.memory_space<vmem>>, vector<1x32x48xbf16>
    %8 = vector.shape_cast %7 : vector<1x32x48xbf16> to vector<32x48xbf16>
    %cst_8 = arith.constant dense<0.000000e+00> : vector<128x48xf32>
    %9 = tpu.matmul %1, %8, %cst_8 {dimension_numbers = #tpu.dot_dimension_numbers<[1], [0], [0], [1], [0, 0, 1, 1], [], []>} : vector<128x32xbf16>, vector<32x48xbf16>, vector<128x48xf32> -> vector<128x48xf32>
    %10 = vector.extract_strided_slice %9 {offsets = [1, 0], sizes = [127, 48], strides = [1, 1]} : vector<128x48xf32> to vector<127x48xf32>
    %11 = vector.extract_strided_slice %9 {offsets = [0, 0], sizes = [1, 48], strides = [1, 1]} : vector<128x48xf32> to vector<1x48xf32>
    %12 = tpu.concatenate %10, %11 in 0 : vector<127x48xf32>, vector<1x48xf32> -> vector<128x48xf32>
    %13 = arith.addf %6, %12 : vector<128x48xf32>
    %c2 = arith.constant 2 : index
    %c0_9 = arith.constant 0 : index
    %c0_10 = arith.constant 0 : index
    %14 = vector.load %arg2[%c2, %c0_9, %c0_10] : memref<5x32x48xbf16, #tpu.memory_space<vmem>>, vector<1x32x48xbf16>
    %15 = vector.shape_cast %14 : vector<1x32x48xbf16> to vector<32x48xbf16>
    %cst_11 = arith.constant dense<0.000000e+00> : vector<128x48xf32>
    %16 = tpu.matmul %1, %15, %cst_11 {dimension_numbers = #tpu.dot_dimension_numbers<[1], [0], [0], [1], [0, 0, 1, 1], [], []>} : vector<128x32xbf16>, vector<32x48xbf16>, vector<128x48xf32> -> vector<128x48xf32>
    %17 = vector.extract_strided_slice %16 {offsets = [2, 0], sizes = [126, 48], strides = [1, 1]} : vector<128x48xf32> to vector<126x48xf32>
    %18 = vector.extract_strided_slice %16 {offsets = [0, 0], sizes = [2, 48], strides = [1, 1]} : vector<128x48xf32> to vector<2x48xf32>
    %19 = tpu.concatenate %17, %18 in 0 : vector<126x48xf32>, vector<2x48xf32> -> vector<128x48xf32>
    %20 = arith.addf %13, %19 : vector<128x48xf32>
    %c3 = arith.constant 3 : index
    %c0_12 = arith.constant 0 : index
    %c0_13 = arith.constant 0 : index
    %21 = vector.load %arg2[%c3, %c0_12, %c0_13] : memref<5x32x48xbf16, #tpu.memory_space<vmem>>, vector<1x32x48xbf16>
    %22 = vector.shape_cast %21 : vector<1x32x48xbf16> to vector<32x48xbf16>
    %cst_14 = arith.constant dense<0.000000e+00> : vector<128x48xf32>
    %23 = tpu.matmul %1, %22, %cst_14 {dimension_numbers = #tpu.dot_dimension_numbers<[1], [0], [0], [1], [0, 0, 1, 1], [], []>} : vector<128x32xbf16>, vector<32x48xbf16>, vector<128x48xf32> -> vector<128x48xf32>
    %24 = vector.extract_strided_slice %23 {offsets = [3, 0], sizes = [125, 48], strides = [1, 1]} : vector<128x48xf32> to vector<125x48xf32>
    %25 = vector.extract_strided_slice %23 {offsets = [0, 0], sizes = [3, 48], strides = [1, 1]} : vector<128x48xf32> to vector<3x48xf32>
    %26 = tpu.concatenate %24, %25 in 0 : vector<125x48xf32>, vector<3x48xf32> -> vector<128x48xf32>
    %27 = arith.addf %20, %26 : vector<128x48xf32>
    %c4 = arith.constant 4 : index
    %c0_15 = arith.constant 0 : index
    %c0_16 = arith.constant 0 : index
    %28 = vector.load %arg2[%c4, %c0_15, %c0_16] : memref<5x32x48xbf16, #tpu.memory_space<vmem>>, vector<1x32x48xbf16>
    %29 = vector.shape_cast %28 : vector<1x32x48xbf16> to vector<32x48xbf16>
    %cst_17 = arith.constant dense<0.000000e+00> : vector<128x48xf32>
    %30 = tpu.matmul %1, %29, %cst_17 {dimension_numbers = #tpu.dot_dimension_numbers<[1], [0], [0], [1], [0, 0, 1, 1], [], []>} : vector<128x32xbf16>, vector<32x48xbf16>, vector<128x48xf32> -> vector<128x48xf32>
    %31 = vector.extract_strided_slice %30 {offsets = [4, 0], sizes = [124, 48], strides = [1, 1]} : vector<128x48xf32> to vector<124x48xf32>
    %32 = vector.extract_strided_slice %30 {offsets = [0, 0], sizes = [4, 48], strides = [1, 1]} : vector<128x48xf32> to vector<4x48xf32>
    %33 = tpu.concatenate %31, %32 in 0 : vector<124x48xf32>, vector<4x48xf32> -> vector<128x48xf32>
    %34 = arith.addf %27, %33 : vector<128x48xf32>
    %c0_18 = arith.constant 0 : index
    %c0_19 = arith.constant 0 : index
    %35 = vector.load %arg3[%c0_18, %c0_19] : memref<1x48xf32, #tpu.memory_space<vmem>>, vector<1x48xf32>
    %36 = vector.broadcast %35 : vector<1x48xf32> to vector<128x48xf32>
    %37 = arith.addf %34, %36 : vector<128x48xf32>
    %cst_20 = arith.constant 0.000000e+00 : f32
    %38 = vector.broadcast %cst_20 : f32 to vector<128x48xf32>
    %39 = arith.maximumf %37, %38 : vector<128x48xf32>
    %c0_21 = arith.constant 0 : index
    %c0_22 = arith.constant 0 : index
    %40 = vector.load %arg4[%c0_21, %c0_22] : memref<128x48xf32, #tpu.memory_space<vmem>>, vector<128x48xf32>
    %41 = arith.mulf %39, %40 : vector<128x48xf32>
    %42 = vector.shape_cast %41 : vector<128x48xf32> to vector<8x16x48xf32>
    %cst_23 = arith.constant dense<0xFF800000> : vector<8x48xf32>
    %43 = vector.multi_reduction <maximumf>, %42, %cst_23 [1] : vector<8x16x48xf32> to vector<8x48xf32>
    %44 = arith.truncf %43 : vector<8x48xf32> to vector<8x48xbf16>
    %c0_24 = arith.constant 0 : index
    %c0_25 = arith.constant 0 : index
    %45 = vector.load %arg5[%c0_24, %c0_25] : memref<48x128xbf16, #tpu.memory_space<vmem>>, vector<48x128xbf16>
    %cst_26 = arith.constant dense<0.000000e+00> : vector<8x128xf32>
    %46 = tpu.matmul %44, %45, %cst_26 {dimension_numbers = #tpu.dot_dimension_numbers<[1], [0], [0], [1], [0, 0, 1, 1], [], []>} : vector<8x48xbf16>, vector<48x128xbf16>, vector<8x128xf32> -> vector<8x128xf32>
    %c0_27 = arith.constant 0 : index
    %c0_28 = arith.constant 0 : index
    %47 = vector.load %arg6[%c0_27, %c0_28] : memref<1x128xf32, #tpu.memory_space<vmem>>, vector<1x128xf32>
    %48 = vector.broadcast %47 : vector<1x128xf32> to vector<8x128xf32>
    %49 = arith.addf %46, %48 : vector<8x128xf32>
    %c0_29 = arith.constant 0 : index
    %c0_30 = arith.constant 0 : index
    %50 = vector.load %arg7[%c0_29, %c0_30] : memref<8x128xf32, #tpu.memory_space<vmem>>, vector<8x128xf32>
    tpu.vector_store %arg7[%c0_29, %c0_30], %49 {strides = array<i32>} : memref<8x128xf32, #tpu.memory_space<vmem>>, vector<8x128xf32>,
    return
  }
  func.func @transform_0(%arg0: i32) -> (i32, i32, i32) {
    %c0_i32 = arith.constant 0 : i32
    %c0_i32_0 = arith.constant 0 : i32
    %c0_i32_1 = arith.constant 0 : i32
    return %arg0, %c0_i32, %c0_i32_0 : i32, i32, i32
  }
  func.func @transform_1(%arg0: i32) -> (i32, i32, i32) {
    %c0_i32 = arith.constant 0 : i32
    %c0_i32_0 = arith.constant 0 : i32
    %c0_i32_1 = arith.constant 0 : i32
    %c0_i32_2 = arith.constant 0 : i32
    return %c0_i32, %c0_i32_0, %c0_i32_1 : i32, i32, i32
  }
  func.func @transform_2(%arg0: i32) -> (i32, i32) {
    %c0_i32 = arith.constant 0 : i32
    %c0_i32_0 = arith.constant 0 : i32
    %c0_i32_1 = arith.constant 0 : i32
    return %c0_i32, %c0_i32_0 : i32, i32
  }
  func.func @transform_3(%arg0: i32) -> (i32, i32) {
    %c0_i32 = arith.constant 0 : i32
    %c0_i32_0 = arith.constant 0 : i32
    %c0_i32_1 = arith.constant 0 : i32
    return %c0_i32, %c0_i32_0 : i32, i32
  }
  func.func @transform_4(%arg0: i32) -> (i32, i32) {
    %c0_i32 = arith.constant 0 : i32
    %c0_i32_0 = arith.constant 0 : i32
    %c0_i32_1 = arith.constant 0 : i32
    return %c0_i32, %c0_i32_0 : i32, i32
  }
  func.func @transform_5(%arg0: i32) -> (i32, i32) {
    %c0_i32 = arith.constant 0 : i32
    %c0_i32_0 = arith.constant 0 : i32
    %c0_i32_1 = arith.constant 0 : i32
    return %c0_i32, %c0_i32_0 : i32, i32
  }
  func.func @transform_6(%arg0: i32) -> (i32, i32) {
    %c0_i32 = arith.constant 0 : i32
    %c0_i32_0 = arith.constant 0 : i32
    return %arg0, %c0_i32 : i32, i32
  }
}

</mosaic_0001>

<bundles_post_ra>
// kernel: tpu_custom_call.1
= control target key start
LH: loop header
LB: loop body
LE: loop exit
PB: predicated region body
PF: predicated region fallthrough
CT: control target
= control target key end

     0   :  { %6 = vsyncpa [#allocation3], 0  ;;  %s103_s0 = inlined_call_operand.hbm [shape: f32[8,128], index: 0, kind: input, shape index: {}]   ;;  %s104_s1 = inlined_call_operand.hbm [shape: f32[8,128], index: 1, kind: output, shape index: {}]  }
   0x1   :  { %7 = vsyncpa [#allocation4], 0  ;;  %s85_s6 = smov [#allocation2]  }
   0x2   :  { %s14_s7 = sshll.u32 %s85_s6, 4  ;;  %s15_s7 = int_to_ptr.vmem [resolvable:$true] %s14_s7 }
   0x3   :  { %s49_s8 = scalar_lea.vmem %s15_s7, 128  ;;  %p54_p1 = scmp.lt.s32.totalorder %s15_s7, %s15_s7 }
   0x4   :  { %p50_p0 = scmp.ne.s32.totalorder %s15_s7, %s49_s8  ;;  %p55_p2 = scmp.lt.s32.totalorder %s49_s8, %s49_s8 }
   0x6   :  { %p56_p3 = por %p55_p2, %p54_p1 }
   0x8   :  { %p57_p4 = pnand %p56_p3, %p50_p0 }
   0xa   :  { %60 = shalt.err (!%p57_p4)
}
   0xb   :  { %17 = dma.hbm_to_vmem [thread:$0]  %s103_s0, 128, %s15_s7, [#allocation3]  }
   0xc   :  { %81 = dma.done.wait [#allocation3], 128  }
   0xd   :  { %82 = vsyncadd [#allocation3], 4294967168  ;;  %s86_s11 = smov [#allocation5]   ;;  %v21_v0 = vld [vmem:[#allocation2] sm:$0xff] }
   0xe   :  { %s30_s12 = sshll.u32 %s86_s11, 4  ;;  %v22_v1 = vrot.slane %v21_v0, 7  ;;  %s31_s12 = int_to_ptr.vmem [resolvable:$true] %s30_s12 }
   0xf   :  { %s61_s13 = scalar_lea.vmem %s31_s12, 128  ;;  %p66_p6 = scmp.lt.s32.totalorder %s31_s12, %s31_s12 }
  0x10   :  { %23 = vst [vmem:[#allocation5] sm:$0xff] %v22_v1  ;;  %p62_p5 = scmp.ne.s32.totalorder %s31_s12, %s61_s13  ;;  %p67_p7 = scmp.lt.s32.totalorder %s61_s13, %s61_s13 }
  0x12   :  { %p68_p8 = por %p67_p7, %p66_p6 }
  0x14   :  { %p69_p9 = pnand %p68_p8, %p62_p5 }
  0x16   :  { %72 = shalt.err (!%p69_p9)
}
  0x17   :  { %33 = dma.vmem_to_hbm [thread:$0]  %s31_s12, 128, %s104_s1, [#allocation4]  }
  0x18   :  { %83 = dma.done.wait [#allocation4], 128  }
  0x19   :  { %84 = vsyncadd [#allocation4], 4294967168 }
  0x1a   :  { %37 = vsyncpa [#allocation3], 1 }
  0x1b   :  { %38 = vsyncpa [#allocation4], 1 }

// kernel: tpu_custom_call.1
= control target key start
LH: loop header
LB: loop body
LE: loop exit
PB: predicated region body
PF: predicated region fallthrough
CT: control target
= control target key end

     0   :  { %11 = vsyncpa [#allocation3], 0  ;;  %s2540_s0 = inlined_call_operand.vmem [shape: bf16[16,16,32], index: 0, kind: input, shape index: {}]   ;;  %s2541_s1 = inlined_call_operand.hbm [shape: bf16[5,32,48], index: 1, kind: input, shape index: {}]   ;;  %s2542_s2 = inlined_call_operand.vmem [shape: f32[1,48], index: 2, kind: input, shape index: {}]   ;;  %s2543_s3 = inlined_call_operand.vmem [shape: f32[128,48], index: 3, kind: input, shape index: {}]   ;;  %s2544_s4 = inlined_call_operand.vmem [shape: bf16[48,128], index: 4, kind: input, shape index: {}]   ;;  %s2545_s5 = inlined_call_operand.vmem [shape: f32[1,128], index: 5, kind: input, shape index: {}]   ;;  %s2546_s6 = inlined_call_operand.hbm [shape: f32[16,128], index: 6, kind: output, shape index: {}]  }
   0x1   :  { %12 = vsyncpa [#allocation4], 0 }
   0x2   :  { %14 = vsyncpa [#allocation4 + $0x1], 0  ;;  %s2031_s21 = smov 0   ;;  %s2033_s22 = smov 0  }
   0x3   :  { %s2035_s23 = smov 0   ;;  %s2037_s24 = smov 0  }
   0x4 LB: > { %s2052_s25 = sadd.s32 4294967295, %s1988_s24   ;;  %s1576_s26 = sadd.s32 4294967294, %s1988_s24   ;;  %s1988_s24 = sphi %s2037_s24, %s2554_s24   ;;  %s1984_s23 = sphi %s2035_s23, %s2553_s23   ;;  %s1980_s22 = sphi %s2033_s22, %s2552_s22   ;;  %s1976_s21 = sphi %s2031_s21, %s2551_s21  }
   0x5   : > { %s2056_s27 = sadd.s32 1, %s1988_s24   ;;  %s158_s28 = sadd.s32 1, %s1984_s23 }
   0x6   : > { %s155_s29 = ssub.s32 %s1988_s24, %s2056_s27  ;;  %p168_p0 = scmp.ne.s32.totalorder %s1984_s23, %s1980_s22 }
   0x7   : > { %p156_p1 = scmp.eq.s32.totalorder %s155_s29, 0  ;;  %p169_p2 = scmp.eq.s32.totalorder %s2052_s25, 1 }
   0x8   : > { %p174_p3 = scmp.ne.s32.totalorder %s1980_s22, %s1976_s21  ;;  %p175_p4 = scmp.eq.s32.totalorder %s1576_s26, 1 }
   0x9   : > { %s2067_s30 = scalar_select %p156_p1, %s1984_s23, %s158_s28  }
   0xa   : > { %p2069_p5 = por %p169_p2, %p168_p0  ;;  %p2073_p6 = por %p175_p4, %p174_p3 }
   0xb   : > { %p1577_p7 = scmp.ge.s32.totalorder %s1988_s24, 1  ;;  %p182_p8 = scmp.lt.s32.totalorder %s1988_s24, 3 }
   0xc   : > { %s2548_s8 = scalar_select %p2073_p6, 1, 0 }
   0xd   : > { %p1837_p9 = scmp.eq.s32.totalorder %s2052_s25, 0  ;;  %p2080_p10 = pnand %p1577_p7, %p182_p8 }
   0xe   : > { %s1990_s10 = smov [#allocation2]  }
   0xf   : > { %s194_s11 = sshll.u32 %s1990_s10, 4  ;;  %p1829_p11 = pneg %p2080_p10  ;;  %s195_s11 = int_to_ptr.vmem [resolvable:$true] %s194_s11 }
  0x10   : > { %s1909_s12 = scalar_lea.vmem %s195_s11, 1280  ;;  %p1917_p3 = scmp.lt.s32.totalorder %s195_s11, %s195_s11 }
  0x11   : > { %p1830_p12 = pnand %p1837_p9, %p1829_p11  ;;  %p1910_p0 = scmp.ne.s32.totalorder %s195_s11, %s1909_s12 }
  0x12   : > { %p1918_p4 = scmp.lt.s32.totalorder %s1909_s12, %s1909_s12 }
  0x13   : > { %p1900_p13 = pneg %p1830_p12 }
  0x14   : > { %p1919_p6 = por %p1918_p4, %p1917_p3 }
  0x15   : > { %p1912_p1 = pnand %p1910_p0, %p1900_p13 }
  0x17   : > { %p1913_p2 = pneg %p1912_p1 }
  0x19   : > { %p1920_p7 = pnand %p1919_p6, %p1913_p2 }
  0x1b   : > { %1923 = shalt.err (!%p1920_p7)
}
  0x1c   : > { %s1991_s13 = smov 64   ;;  %s1992_s14 = smov 4  }
  0x1d   : > { %1832 = dma.hbm_to_vmem [thread:$0]  (!%p1830_p12), %s2541_s1, 1280, %s195_s11, [#allocation3], %s1991_s13, %s1991_s13, %s1992_s14  }
  0x1e   : > { %232 = sbr.rel (%p2080_p10) target bundleno = 577 (0x241), region = 44 }
  0x23   : > { %1967 = dma.done.wait (%p1837_p9), [#allocation3], 1280  }
  0x24   : > { %1969 = vsyncadd (%p1837_p9), [#allocation3], 4294966016  ;;  %s1583_s17 = sshll.u32 %s2052_s25, 3  ;;  %v1877_v0 = vld [vmem:[#allocation2 + $0x18] sm:$0xff]   ;;  %v1878_v1 = vld [vmem:[#allocation2 + $0x10] sm:$0xff]   ;;  %vm348_vm0 = vcmask 261120  }
  0x25   : > { %p264_p8 = scmp.lt.s32.totalorder %s1583_s17, 15  ;;  %1709 = vmatprep.subr.bf16.mxu0 %v1877_v0  ;;  %1819 = vmatprep.subr.bf16.mxu1 %v1877_v0  ;;  %v1883_v6 = vld [vmem:[#allocation2 + $0x8] sm:$0xff]   ;;  %v1885_v8 = vld [vmem:[#allocation2] sm:$0xff]   ;;  %v1891_v13 = vld [vmem:[#allocation2 + $0x38] sm:$0xff]   ;;  %v1993_v19 = vmov 0.0   ;;  %vm1994_vm1 = vmmov 0  }
  0x26   : > { %1710 = vmatpush3.bf16.msra.mxu0 %v1877_v0  ;;  %1821 = vmatpush3.bf16.msra.mxu1 %v1877_v0  ;;  %v1884_v7 = vld [vmem:[#allocation2 + $0x28] sm:$0xff]   ;;  %v1888_v10 = vld [vmem:[#allocation2 + $0x20] sm:$0xff]   ;;  %v1893_v15 = vld [vmem:[#allocation2 + $0x30] sm:$0xff]   ;;  %vm486_vm2 = vcmask 1046528   ;;  %vm775_vm3 = vcmask 1045504   ;;  %vm971_vm4 = vcmask 1044480  }
  0x27   : > { %s2556_s17 = smov (!%p264_p8, %s1583_s17), 15  ;;  %1711 = vmatprep.subr.bf16.mxu0 %v1878_v1  ;;  %1820 = vmatprep.subr.bf16.mxu1 %v1878_v1  ;;  %v1892_v14 = vld [vmem:[#allocation2 + $0x48] sm:$0xff]   ;;  %v1894_v17 = vld [vmem:[#allocation2 + $0x40] sm:$0xff]   ;;  %v1895_v18 = vld [vmem:[%s2544_s4 + $0x10] sm:$0xff]   ;;  %vm1167_vm5 = vcmask 1043456   ;;  %vm1304_vm6 = vcmask 392192  }
  0x28   : > { %s1654_s18 = sshll.u32 %s2556_s17, 3  ;;  %v1896_v20 = vld [vmem:[%s2544_s4 + $0x8] sm:$0xff]   ;;  %v1897_v21 = vld [vmem:[%s2544_s4] sm:$0xff]   ;;  %vm1414_vm7 = vcmask 1041409   ;;  %vm1416_vm8 = vcmask 1042434   ;;  %vm1418_vm9 = vcmask 1043459  }
  0x29   : > { %s2101_s26 = scalar_lea.vmem %s2540_s0, %s1654_s18  ;;  %vm1420_vm10 = vcmask 1044484   ;;  %vm1422_vm11 = vcmask 1045509   ;;  %vm1424_vm12 = vcmask 1046534   ;;  %vm1426_vm13 = vcmask 1047559   ;;  %s260_s17 = sand.u32 1, %s1980_s22  }
  0x2a   : > { %v2104_v2 = vld [vmem:[%s2101_s26] sm:$0xff]   ;;  %v2107_v3 = vld [vmem:[%s2101_s26 + $0x30] sm:$0xff]   ;;  %v2110_v4 = vld [vmem:[%s2101_s26 + $0x8] sm:$0xff]   ;;  %1712 = vmatpush3.bf16.msra.mxu0 %v1878_v1  ;;  %1822 = vmatpush3.bf16.msra.mxu1 %v1878_v1  ;;  %s1582_s18 = sshll.u32 %s260_s17, 3  ;;  %s1492_s12 = scalar_lea.sflag [#allocation4], %s260_s17 }
  0x2b   : > { %1713 = vmatprep.mubr.msk.bf16.mxu0 %vm348_vm0, %v2104_v2  ;;  %1725 = vmatprep.mubr.msk.bf16.mxu1 %vm348_vm0, %v2107_v3  ;;  %v2117_v5 = vld [vmem:[%s2101_s26 + $0x38] sm:$0xff]   ;;  %v1886_v9 = vld [vmem:[%s2101_s26 + $0x10] sm:$0xff]   ;;  %v1889_v12 = vld [vmem:[%s2101_s26 + $0x20] sm:$0xff]   ;;  %s262_s28 = scalar_lea.vmem [#allocation5], %s1582_s18 }
  0x2c   : > { %1729 = vmatprep.subr.bf16.mxu1 %v1883_v6  ;;  %1749 = vmatprep.subr.bf16.mxu0 %v1884_v7  ;;  %v1887_v11 = vld [vmem:[%s2101_s26 + $0x18] sm:$0xff]   ;;  %v1890_v16 = vld [vmem:[%s2101_s26 + $0x28] sm:$0xff]   ;;  %s1651_s26 = sshll.u32 %s2052_s25, 7  ;;  %s1505_s29 = sshll.u32 %s262_s28, 4  ;;  %s2501_s29 = int_to_ptr.vmem [resolvable:$true] %s1505_s29 }
  0x2d   : > { %1714 = vmatmul.mubr.msk.bf16.vlgmr.msra.gmra.mxu0 %vm348_vm0, %v2110_v4  ;;  %1726 = vmatmul.mubr.msk.bf16.vlgmr.msra.gmra.mxu1 %vm348_vm0, %v2117_v5  ;;  %s2499_s11 = scalar_lea.hbm %s2546_s6, %s1651_s26  ;;  %s1924_s13 = scalar_lea.vmem %s2501_s29, 128 }
  0x2e   : > { %1730 = vmatpush3.bf16.msra.mxu1 %v1883_v6  ;;  %1750 = vmatpush3.bf16.msra.mxu0 %v1884_v7  ;;  %p1925_p6 = scmp.ne.s32.totalorder %s2501_s29, %s1924_s13  ;;  %s1995_s25 = smov [#allocation5]  }
  0x2f   : > { %1731 = vmatprep.subr.bf16.mxu1 %v1885_v8  ;;  %1717 = vmatprep.mubr.msk.bf16.mxu0 %vm348_vm0, %v1886_v9  ;;  %s1928_s14 = sshll.u32 %s1995_s25, 4  ;;  %s1929_s14 = int_to_ptr.vmem [resolvable:$false] %s1928_s14 }
  0x30   : > { %1733 = vmatprep.mubr.msk.bf16.mxu1 %vm348_vm0, %v2104_v2  ;;  %1751 = vmatprep.subr.bf16.mxu0 %v1888_v10  ;;  %p1926_p9 = pnand %p1925_p6, %p2069_p5  ;;  %s1930_s15 = scalar_lea.vmem %s1929_s14, 256 }
  0x31   : > { %p1931_p11 = scmp.lt.s32.totalorder %s2501_s29, %s1929_s14  ;;  %p1932_p12 = scmp.lt.s32.totalorder %s1930_s15, %s1924_s13 }
  0x32   : > { %1732 = vmatpush3.bf16.msra.mxu1 %v1885_v8  ;;  %1752 = vmatpush3.bf16.msra.mxu0 %v1888_v10  ;;  %p1927_p10 = pneg %p1926_p9 }
  0x33   : > { %1769 = vmatprep.subr.bf16.mxu1 %v1891_v13  ;;  %1789 = vmatprep.subr.bf16.mxu0 %v1892_v14  ;;  %p1933_p13 = por %p1932_p12, %p1931_p11 }
  0x35   : > { %1718 = vmatmul.mubr.msk.bf16.gmra.mxu0 %vm348_vm0, %v1887_v11  ;;  %1734 = vmatmul.mubr.msk.bf16.vlgmr.msra.gmra.mxu1 %vm348_vm0, %v2110_v4  ;;  %p1934_p0 = pnand %p1933_p13, %p1927_p10 }
  0x36   : > { %1721 = vmatprep.mubr.msk.bf16.mxu0 %vm348_vm0, %v1889_v12  ;;  %1737 = vmatprep.mubr.msk.bf16.mxu1 %vm348_vm0, %v1886_v9 }
  0x37   : > { %1770 = vmatpush3.bf16.msra.mxu1 %v1891_v13 }
  0x38   : > { %1771 = vmatprep.subr.bf16.mxu1 %v1893_v15 }
  0x3b   : > { %1772 = vmatpush3.bf16.msra.mxu1 %v1893_v15 }
  0x3c   : > { %1809 = vmatprep.subr.bf16.mxu1 %v1993_v19 }
  0x3d   : > { %1722 = vmatmul.mubr.msk.bf16.gmra.mxu0 %vm348_vm0, %v1890_v16  ;;  %1738 = vmatmul.mubr.msk.bf16.gmra.mxu1 %vm348_vm0, %v1887_v11 }
  0x3e   : > { %1741 = vmatprep.mubr.msk.bf16.mxu1 %vm348_vm0, %v1889_v12  ;;  %1753 = vmatprep.mubr.msk.bf16.mxu0 %vm348_vm0, %v2104_v2 }
  0x45   : > { %1742 = vmatmul.mubr.msk.bf16.gmra.mxu1 %vm348_vm0, %v1890_v16  ;;  %1754 = vmatmul.mubr.msk.bf16.vlgmr.msra.gmra.mxu0 %vm348_vm0, %v2110_v4 }
  0x46   : > { %1790 = vmatpush3.bf16.msra.mxu0 %v1892_v14  ;;  %1745 = vmatprep.mubr.msk.bf16.mxu1 %vm348_vm0, %v2107_v3 }
  0x47   : > { %1757 = vmatprep.mubr.msk.bf16.mxu0 %vm348_vm0, %v1886_v9  ;;  %1791 = vmatprep.subr.bf16.mxu0 %v1894_v17 }
  0x4a   : > { %1792 = vmatpush3.bf16.msra.mxu0 %v1894_v17 }
  0x4d   : > { %1746 = vmatmul.mubr.msk.bf16.gmra.mxu1 %vm348_vm0, %v2117_v5  ;;  %1758 = vmatmul.mubr.msk.bf16.gmra.mxu0 %vm348_vm0, %v1887_v11 }
  0x4e   : > { %1761 = vmatprep.mubr.msk.bf16.mxu0 %vm348_vm0, %v1889_v12  ;;  %1773 = vmatprep.mubr.msk.bf16.mxu1 %vm348_vm0, %v2104_v2 }
  0x55   : > { %1762 = vmatmul.mubr.msk.bf16.gmra.mxu0 %vm348_vm0, %v1890_v16  ;;  %1774 = vmatmul.mubr.msk.bf16.vlgmr.msra.gmra.mxu1 %vm348_vm0, %v2110_v4 }
  0x56   : > { %1765 = vmatprep.mubr.msk.bf16.mxu0 %vm348_vm0, %v2107_v3  ;;  %1777 = vmatprep.mubr.msk.bf16.mxu1 %vm348_vm0, %v1886_v9 }
  0x57   : > { %1810 = vmatpush3.bf16.msra.mxu1 %v1895_v18 }
  0x58   : > { %1811 = vmatprep.subr.bf16.mxu1 %v1993_v19 }
  0x5b   : > { %1812 = vmatpush3.bf16.msra.mxu1 %v1896_v20 }
  0x5c   : > { %1813 = vmatprep.subr.bf16.mxu1 %v1993_v19 }
  0x5d   : > { %1766 = vmatmul.mubr.msk.bf16.gmra.mxu0 %vm348_vm0, %v2117_v5  ;;  %1778 = vmatmul.mubr.msk.bf16.gmra.mxu1 %vm348_vm0, %v1887_v11 }
  0x5e   : > { %1781 = vmatprep.mubr.msk.bf16.mxu1 %vm348_vm0, %v1889_v12  ;;  %1793 = vmatprep.mubr.msk.bf16.mxu0 %vm348_vm0, %v2104_v2 }
  0x5f   : > { %1814 = vmatpush3.bf16.msra.mxu1 %v1897_v21 }
  0x65   : > { %1782 = vmatmul.mubr.msk.bf16.gmra.mxu1 %vm348_vm0, %v1890_v16  ;;  %1794 = vmatmul.mubr.msk.bf16.vlgmr.msra.gmra.mxu0 %vm348_vm0, %v2110_v4 }
  0x66   : > { %1785 = vmatprep.mubr.msk.bf16.mxu1 %vm348_vm0, %v2107_v3  ;;  %1797 = vmatprep.mubr.msk.bf16.mxu0 %vm348_vm0, %v1886_v9 }
  0x6d   : > { %1786 = vmatmul.mubr.msk.bf16.gmra.mxu1 %vm348_vm0, %v2117_v5  ;;  %1798 = vmatmul.mubr.msk.bf16.gmra.mxu0 %vm348_vm0, %v1887_v11 }
  0x6e   : > { %1801 = vmatprep.mubr.msk.bf16.mxu0 %vm348_vm0, %v1889_v12  ;;  %1815 = vmatprep.mubr.msk.bf16.mxu1 %vm1994_vm1, %v1993_v19 }
  0x75   : > { %1802 = vmatmul.mubr.msk.bf16.gmra.mxu0 %vm348_vm0, %v1890_v16 }
  0x76   : > { %1805 = vmatprep.mubr.msk.bf16.mxu0 %vm348_vm0, %v2107_v3 }
  0x7d   : > { %1806 = vmatmul.mubr.msk.bf16.gmra.mxu0 %vm348_vm0, %v2117_v5 }
  0xed   : > { %v1715_v22 = vpop.f32.mrf.mxu0  ;;  %v2188_v23 = vpop.f32.mrf.mxu1 }
  0xee   : > { %v490_v28 = vrot.slane %v1715_v22, 1  ;;  %v514_v4 = vrot.slane %v2188_v23, 1 }
  0xef   : > { %v407_v24 = vpop.f32.mrf.mxu0  ;;  %v2190_v25 = vpop.f32.mrf.mxu1 }
  0xf0   : > { %v487_v32 = vrot.slane %v407_v24, 1  ;;  %v510_v5 = vrot.slane %v2190_v25, 1 }
  0xf1   : > { %v1716_v26 = vpop.f32.mrf.mxu0  ;;  %v1728_v27 = vpop.f32.mrf.mxu1 }
  0xf2   : > { %v492_v29 = vrot.slane %v1716_v26, 1  ;;  %v516_v6 = vrot.slane %v1728_v27, 1 }
  0xf3   : > { %v410_v30 = vpop.f32.mrf.mxu0  ;;  %v458_v31 = vpop.f32.mrf.mxu1 }
  0xf4   : > { %v488_v33 = vrot.slane %v410_v30, 1  ;;  %v493_v34 = vsel %vm486_vm2, %v490_v28, %v492_v29  ;;  %v512_v7 = vrot.slane %v458_v31, 1  ;;  %v517_v15 = vsel %vm486_vm2, %v514_v4, %v516_v6 }
  0xf5   : > { %v2193_v35 = vpop.f32.mrf.mxu0  ;;  %v1735_v36 = vpop.f32.mrf.mxu1  ;;  %v535_v17 = vsel %vm486_vm2, %v516_v6, %v487_v32 }
  0xf6   : > { %v489_v37 = vsel %vm486_vm2, %v487_v32, %v488_v33  ;;  %v491_v38 = vsel %vm486_vm2, %v488_v33, %v490_v28  ;;  %v498_v44 = vrot.slane %v2193_v35, 1  ;;  %v591_v14 = vadd.f32 %v1735_v36, %v493_v34 }
  0xf7   : > { %v423_v39 = vpop.f32.mrf.mxu0  ;;  %v582_v40 = vpop.f32.mrf.mxu1  ;;  %v513_v16 = vsel %vm486_vm2, %v510_v5, %v512_v7  ;;  %v2219_v21 = vsel %vm486_vm2, %v512_v7, %v514_v4 }
  0xf8   : > { %v494_v41 = vrot.slane %v423_v39, 1  ;;  %v583_v24 = vadd.f32 %v582_v40, %v489_v37 }
  0xf9   : > { %v1720_v42 = vpop.f32.mrf.mxu0  ;;  %v1736_v43 = vpop.f32.mrf.mxu1 }
  0xfa   : > { %v500_v45 = vrot.slane %v1720_v42, 1  ;;  %v495_v46 = vsel %vm486_vm2, %v492_v29, %v494_v41 }
  0xfb   : > { %v426_v47 = vpop.f32.mrf.mxu0  ;;  %v585_v48 = vpop.f32.mrf.mxu1  ;;  %v594_v28 = vadd.f32 %v1736_v43, %v495_v46 }
  0xfc   : > { %v501_v49 = vsel %vm486_vm2, %v498_v44, %v500_v45  ;;  %v496_v8 = vrot.slane %v426_v47, 1  ;;  %v586_v29 = vadd.f32 %v585_v48, %v491_v38 }
  0xfd   : > { %v2200_v50 = vpop.f32.mrf.mxu0  ;;  %v1739_v51 = vpop.f32.mrf.mxu1 }
  0xfe   : > { %v497_v18 = vsel %vm486_vm2, %v494_v41, %v496_v8  ;;  %v506_v30 = vrot.slane %v2200_v50, 1  ;;  %v607_v31 = vadd.f32 %v1739_v51, %v501_v49  ;;  %v499_v35 = vsel %vm486_vm2, %v496_v8, %v498_v44 }
  0xff   : > { %v439_v52 = vpop.f32.mrf.mxu0  ;;  %v598_v53 = vpop.f32.mrf.mxu1 }
 0x100   : > { %v502_v11 = vrot.slane %v439_v52, 1  ;;  %v599_v34 = vadd.f32 %v598_v53, %v497_v18 }
 0x101   : > { %v1724_v54 = vpop.f32.mrf.mxu0  ;;  %v1740_v55 = vpop.f32.mrf.mxu1 }
 0x102   : > { %v508_v19 = vrot.slane %v1724_v54, 1  ;;  %v503_v25 = vsel %vm486_vm2, %v500_v45, %v502_v11 }
 0x103   : > { %v442_v56 = vpop.f32.mrf.mxu0  ;;  %v601_v57 = vpop.f32.mrf.mxu1  ;;  %v2232_v39 = vadd.f32 %v1740_v55, %v503_v25 }
 0x104   : > { %v504_v20 = vrot.slane %v442_v56, 1  ;;  %v602_v40 = vadd.f32 %v601_v57, %v499_v35  ;;  %v509_v41 = vsel %vm486_vm2, %v506_v30, %v508_v19  ;;  %v511_v45 = vsel %vm486_vm2, %v508_v19, %v510_v5 }
 0x105   : > { %v1743_v58 = vpop.f32.mrf.mxu1  ;;  %v1755_v59 = vpop.f32.mrf.mxu0 }
 0x106   : > { %v779_v36 = vrot.slane %v1755_v59, 2  ;;  %v505_v38 = vsel %vm486_vm2, %v502_v11, %v504_v20  ;;  %v507_v48 = vsel %vm486_vm2, %v504_v20, %v506_v30  ;;  %v623_v54 = vadd.f32 %v1743_v58, %v509_v41 }
 0x107   : > { %v614_v60 = vpop.f32.mrf.mxu1  ;;  %v2202_v61 = vpop.f32.mrf.mxu0 }
 0x108   : > { %v776_v37 = vrot.slane %v2202_v61, 2  ;;  %v615_v55 = vadd.f32 %v614_v60, %v505_v38 }
 0x109   : > { %v1744_v62 = vpop.f32.mrf.mxu1  ;;  %v2204_v63 = vpop.f32.mrf.mxu0 }
 0x10a   : > { %v781_v26 = vrot.slane %v2204_v63, 2  ;;  %v2247_v56 = vadd.f32 %v1744_v62, %v511_v45 }
 0x10b   : > { %v617_v0 = vpop.f32.mrf.mxu1  ;;  %v699_v1 = vpop.f32.mrf.mxu0 }
 0x10c   : > { %v777_v27 = vrot.slane %v699_v1, 2  ;;  %v782_v46 = vsel %vm775_vm3, %v779_v36, %v781_v26  ;;  %v618_v57 = vadd.f32 %v617_v0, %v507_v48 }
 0x10d   : > { %v1747_v2 = vpop.f32.mrf.mxu1  ;;  %v2206_v3 = vpop.f32.mrf.mxu0  ;;  %v827_v59 = vadd.f32 %v782_v46, %v591_v14 }
 0x10e   : > { %v778_v44 = vsel %vm775_vm3, %v776_v37, %v777_v27  ;;  %v780_v49 = vsel %vm775_vm3, %v777_v27, %v779_v36  ;;  %v2249_v1 = vadd.f32 %v1747_v2, %v517_v15  ;;  %v787_v4 = vrot.slane %v2206_v3, 2 }
 0x10f   : > { %v630_v9 = vpop.f32.mrf.mxu1  ;;  %v2210_v10 = vpop.f32.mrf.mxu0  ;;  %v825_v63 = vadd.f32 %v778_v44, %v583_v24  ;;  %v826_v7 = vadd.f32 %v780_v49, %v586_v29 }
 0x110   : > { %v783_v47 = vrot.slane %v2210_v10, 2  ;;  %v2252_v8 = vadd.f32 %v630_v9, %v513_v16 }
 0x111   : > { %v1748_v12 = vpop.f32.mrf.mxu1  ;;  %v2212_v13 = vpop.f32.mrf.mxu0 }
 0x112   : > { %v789_v50 = vrot.slane %v2212_v13, 2  ;;  %v784_v10 = vsel %vm775_vm3, %v781_v26, %v783_v47  ;;  %v2255_v11 = vadd.f32 %v1748_v12, %v535_v17 }
 0x113   : > { %v2221_v22 = vpop.f32.mrf.mxu1  ;;  %v715_v23 = vpop.f32.mrf.mxu0  ;;  %v828_v16 = vadd.f32 %v784_v10, %v594_v28 }
 0x114   : > { %v785_v51 = vrot.slane %v715_v23, 2  ;;  %v790_v58 = vsel %vm775_vm3, %v787_v4, %v789_v50  ;;  %v2267_v24 = vadd.f32 %v2221_v22, %v2219_v21 }
 0x115   : > { %v2226_v32 = vpop.f32.mrf.mxu0  ;;  %v2228_v33 = vpop.f32.mrf.mxu1  ;;  %v831_v23 = vadd.f32 %v790_v58, %v607_v31 }
 0x116   : > { %v786_v60 = vsel %vm775_vm3, %v783_v47, %v785_v51  ;;  %v788_v3 = vsel %vm775_vm3, %v785_v51, %v787_v4  ;;  %v975_v14 = vrot.slane %v2228_v33, 3  ;;  %v795_v18 = vrot.slane %v2226_v32, 2 }
 0x117   : > { %v728_v42 = vpop.f32.mrf.mxu0  ;;  %v2236_v43 = vpop.f32.mrf.mxu1  ;;  %v2269_v27 = vadd.f32 %v786_v60, %v599_v34  ;;  %v2271_v29 = vadd.f32 %v788_v3, %v602_v40 }
 0x118   : > { %v791_v62 = vrot.slane %v728_v42, 2  ;;  %v972_v12 = vrot.slane %v2236_v43, 3 }
 0x119   : > { %v1764_v52 = vpop.f32.mrf.mxu0  ;;  %v1776_v53 = vpop.f32.mrf.mxu1 }
 0x11a   : > { %v797_v0 = vrot.slane %v1764_v52, 2  ;;  %v977_v15 = vrot.slane %v1776_v53, 3  ;;  %v792_v28 = vsel %vm775_vm3, %v789_v50, %v791_v62 }
 0x11b   : > { %v731_v5 = vpop.f32.mrf.mxu0  ;;  %v895_v6 = vpop.f32.mrf.mxu1  ;;  %v832_v48 = vadd.f32 %v792_v28, %v2232_v39 }
 0x11c   : > { %v793_v9 = vrot.slane %v731_v5, 2  ;;  %v973_v17 = vrot.slane %v895_v6, 3  ;;  %v798_v30 = vsel %vm775_vm3, %v795_v18, %v797_v0  ;;  %v978_v35 = vsel %vm971_vm4, %v975_v14, %v977_v15 }
 0x11d   : > { %v1767_v13 = vpop.f32.mrf.mxu0  ;;  %v2259_v2 = vpop.f32.mrf.mxu1  ;;  %v835_v49 = vadd.f32 %v798_v30, %v623_v54  ;;  %v1023_v50 = vadd.f32 %v978_v35, %v827_v59 }
 0x11e   : > { %v794_v31 = vsel %vm775_vm3, %v791_v62, %v793_v9  ;;  %v796_v21 = vsel %vm775_vm3, %v793_v9, %v795_v18  ;;  %v974_v34 = vsel %vm971_vm4, %v972_v12, %v973_v17  ;;  %v976_v36 = vsel %vm971_vm4, %v973_v17, %v975_v14 }
 0x11f   : > { %v744_v19 = vpop.f32.mrf.mxu0  ;;  %v908_v20 = vpop.f32.mrf.mxu1  ;;  %v803_v40 = vrot.slane %v1767_v13, 2  ;;  %v983_v41 = vrot.slane %v2259_v2, 3  ;;  %v833_v51 = vadd.f32 %v794_v31, %v615_v55  ;;  %v834_v4 = vadd.f32 %v796_v21, %v618_v57 }
 0x120   : > { %v799_v25 = vrot.slane %v744_v19, 2  ;;  %v979_v26 = vrot.slane %v908_v20, 3  ;;  %v1021_v58 = vadd.f32 %v974_v34, %v825_v63  ;;  %v1022_v60 = vadd.f32 %v976_v36, %v826_v7 }
 0x121   : > { %v1768_v32 = vpop.f32.mrf.mxu0  ;;  %v1780_v33 = vpop.f32.mrf.mxu1 }
 0x122   : > { %v805_v22 = vrot.slane %v1768_v32, 2  ;;  %v800_v45 = vsel %vm775_vm3, %v797_v0, %v799_v25  ;;  %v980_v46 = vsel %vm971_vm4, %v977_v15, %v979_v26  ;;  %v985_v44 = vrot.slane %v1780_v33, 3 }
 0x123   : > { %v747_v38 = vpop.f32.mrf.mxu0  ;;  %v911_v42 = vpop.f32.mrf.mxu1  ;;  %v2291_v62 = vadd.f32 %v800_v45, %v2247_v56  ;;  %v2293_v0 = vadd.f32 %v980_v46, %v828_v16 }
 0x124   : > { %v801_v47 = vrot.slane %v747_v38, 2  ;;  %v806_v5 = vsel %vm775_vm3, %v803_v40, %v805_v22  ;;  %v824_v6 = vsel %vm775_vm3, %v805_v22, %v776_v37  ;;  %v981_v10 = vrot.slane %v911_v42, 3  ;;  %v1274_v42 = vld [vmem:[%s2543_s3 + $0x10] sm:$0xff] }
 0x125   : > { %v1783_v52 = vpop.f32.mrf.mxu1  ;;  %v1795_v53 = vpop.f32.mrf.mxu0  ;;  %v986_v55 = vsel %vm971_vm4, %v983_v41, %v985_v44  ;;  %v2300_v61 = vadd.f32 %v806_v5, %v2249_v1  ;;  %v2303_v37 = vadd.f32 %v824_v6, %v2255_v11 }
 0x126   : > { %v802_v57 = vsel %vm775_vm3, %v799_v25, %v801_v47  ;;  %v991_v59 = vrot.slane %v1783_v52, 3  ;;  %v804_v56 = vsel %vm775_vm3, %v801_v47, %v803_v40  ;;  %v1171_v63 = vrot.slane %v1795_v53, 4 }
 0x127   : > { %v924_v39 = vpop.f32.mrf.mxu1  ;;  %v2295_v54 = vpop.f32.mrf.mxu0  ;;  %v982_v3 = vsel %vm971_vm4, %v979_v26, %v981_v10  ;;  %v984_v14 = vsel %vm971_vm4, %v981_v10, %v983_v41  ;;  %v2308_v16 = vadd.f32 %v986_v55, %v831_v23  ;;  %v2311_v1 = vadd.f32 %v802_v57, %v2252_v8  ;;  %v2320_v26 = vld [vmem:[%s2542_s2] ss:$0 sm:$0xff] }
 0x128   : > { %v987_v13 = vrot.slane %v924_v39, 3  ;;  %v1168_v18 = vrot.slane %v2295_v54, 4  ;;  %v2323_v8 = vadd.f32 %v804_v56, %v2267_v24  ;;  %v2326_v30 = vadd.f32 %v982_v3, %v2269_v27  ;;  %v1272_v10 = vld [vmem:[%s2543_s3] sm:$0xff] }
 0x129   : > { %v1784_v7 = vpop.f32.mrf.mxu1  ;;  %v1796_v2 = vpop.f32.mrf.mxu0  ;;  %v2329_v32 = vadd.f32 %v984_v14, %v2271_v29 }
 0x12a   : > { %v993_v15 = vrot.slane %v1784_v7, 3  ;;  %v1173_v9 = vrot.slane %v1796_v2, 4  ;;  %v988_v11 = vsel %vm971_vm4, %v985_v44, %v987_v13 }
 0x12b   : > { %v927_v17 = vpop.f32.mrf.mxu1  ;;  %v1091_v19 = vpop.f32.mrf.mxu0  ;;  %v2339_v36 = vadd.f32 %v988_v11, %v832_v48 }
 0x12c   : > { %v994_v20 = vsel %vm971_vm4, %v991_v59, %v993_v15  ;;  %v1174_v25 = vsel %vm1167_vm5, %v1171_v63, %v1173_v9  ;;  %v989_v23 = vrot.slane %v927_v17, 3  ;;  %v1169_v28 = vrot.slane %v1091_v19, 4 }
 0x12d   : > { %v1219_v33 = vadd.f32 %v1174_v25, %v1023_v50  ;;  %v1787_v35 = vpop.f32.mrf.mxu1  ;;  %v2331_v31 = vpop.f32.mrf.mxu0  ;;  %v2341_v27 = vadd.f32 %v994_v20, %v835_v49 }
 0x12e   : > { %v990_v21 = vsel %vm971_vm4, %v987_v13, %v989_v23  ;;  %v992_v22 = vsel %vm971_vm4, %v989_v23, %v991_v59  ;;  %v1170_v34 = vsel %vm1167_vm5, %v1168_v18, %v1169_v28  ;;  %v1172_v24 = vsel %vm1167_vm5, %v1169_v28, %v1171_v63 }
 0x12f   : > { %v1242_v29 = vadd.f32 %v2320_v26, %v1219_v33  ;;  %v1217_v40 = vadd.f32 %v1170_v34, %v1021_v58  ;;  %v940_v41 = vpop.f32.mrf.mxu1  ;;  %v1104_v38 = vpop.f32.mrf.mxu0  ;;  %v2347_v45 = vadd.f32 %v990_v21, %v833_v51  ;;  %v1218_v46 = vadd.f32 %v1172_v24, %v1022_v60 }
 0x130   : > { %v999_v44 = vrot.slane %v1787_v35, 3  ;;  %v995_v47 = vrot.slane %v940_v41, 3  ;;  %v2349_v52 = vadd.f32 %v992_v22, %v834_v4  ;;  %v1175_v49 = vrot.slane %v1104_v38, 4  ;;  %v1273_v4 = vld [vmem:[%s2543_s3 + $0x8] sm:$0xff] }
 0x131   : > { %v1258_v50 = vmax.f32 %v1242_v29, 0.0  ;;  %v1240_v48 = vadd.f32 %v2320_v26, %v1217_v40  ;;  %v1788_v53 = vpop.f32.mrf.mxu1  ;;  %v1800_v5 = vpop.f32.mrf.mxu0  ;;  %v1241_v6 = vadd.f32 %v2320_v26, %v1218_v46  ;;  %v1179_v57 = vrot.slane %v2331_v31, 4 }
 0x132   : > { %v996_v51 = vsel %vm971_vm4, %v993_v15, %v995_v47  ;;  %v1001_v58 = vrot.slane %v1788_v53, 3  ;;  %v1181_v60 = vrot.slane %v1800_v5, 4  ;;  %v1176_v59 = vsel %vm1167_vm5, %v1173_v9, %v1175_v49 }
 0x133   : > { %v1290_v39 = vmul.f32 %v1274_v42, %v1258_v50  ;;  %v1256_v55 = vmax.f32 %v1240_v48, 0.0  ;;  %v943_v13 = vpop.f32.mrf.mxu1  ;;  %v1107_v56 = vpop.f32.mrf.mxu0  ;;  %v1257_v63 = vmax.f32 %v1241_v6, 0.0  ;;  %v1220_v7 = vadd.f32 %v1176_v59, %v2293_v0 }
 0x134   : > { %v1002_v2 = vsel %vm971_vm4, %v999_v44, %v1001_v58  ;;  %v1020_v3 = vsel %vm971_vm4, %v1001_v58, %v972_v12  ;;  %v2369_v11 = vadd.f32 %v996_v51, %v2291_v62  ;;  %v1182_v0 = vsel %vm1167_vm5, %v1179_v57, %v1181_v60  ;;  %v1275_v12 = vld [vmem:[%s2543_s3 + $0x18] sm:$0xff] }
 0x135   : > { %v1314_v14 = vsel %vm1304_vm6, %v1290_v39, -inf  ;;  %v1288_v15 = vmul.f32 %v1272_v10, %v1256_v55  ;;  %v2372_v17 = vadd.f32 %v1002_v2, %v2300_v61  ;;  %v1803_v9 = vpop.f32.mrf.mxu0  ;;  %v1289_v19 = vmul.f32 %v1273_v4, %v1257_v63  ;;  %v1276_v39 = vld [vmem:[%s2543_s3 + $0x20] sm:$0xff] }
 0x136   : > { %v1243_v20 = vadd.f32 %v2320_v26, %v1220_v7  ;;  %v997_v25 = vrot.slane %v943_v13, 3  ;;  %v2381_v23 = vadd.f32 %v1020_v3, %v2303_v37  ;;  %v1223_v62 = vadd.f32 %v1182_v0, %v2308_v16 }
 0x137   : > { %v1305_v43 = vsel %vm1304_vm6, %v1288_v15, -inf  ;;  %v1177_v61 = vrot.slane %v1107_v56, 4  ;;  %v1120_v28 = vpop.f32.mrf.mxu0  ;;  %v1306_v33 = vsel %vm1304_vm6, %v1289_v19, -inf  ;;  %v1187_v21 = vrot.slane %v1803_v9, 4  ;;  %v1277_v56 = vld [vmem:[%s2543_s3 + $0x28] sm:$0xff]  ;;  %v1279_v9 = vld [vmem:[%s2543_s3 + $0x38] sm:$0xff] }
 0x138   : > { %v1259_v35 = vmax.f32 %v1243_v20, 0.0  ;;  %v998_v31 = vsel %vm971_vm4, %v995_v47, %v997_v25  ;;  %v1307_v22 = vmax.f32 %v1305_v43, %v1306_v33  ;;  %v1246_v34 = vadd.f32 %v2320_v26, %v1223_v62 }
 0x139   : > { %v1000_v24 = vsel %vm971_vm4, %v997_v25, %v999_v44  ;;  %v2389_v29 = vadd.f32 %v998_v31, %v2311_v1  ;;  %v2391_v37 = vpop.f32.mrf.mxu0  ;;  %v1178_v16 = vsel %vm1167_vm5, %v1175_v49, %v1177_v61  ;;  %v1180_v41 = vsel %vm1167_vm5, %v1177_v61, %v1179_v57  ;;  %v1278_v1 = vld [vmem:[%s2543_s3 + $0x30] sm:$0xff] }
 0x13a   : > { %v1291_v40 = vmul.f32 %v1275_v12, %v1259_v35  ;;  %v1183_v38 = vrot.slane %v1120_v28, 4  ;;  %v1308_v42 = vrot.slane %v1307_v22, 4  ;;  %v1262_v46 = vmax.f32 %v1246_v34, 0.0  ;;  %v1282_v28 = vld [vmem:[%s2543_s3 + $0x50] sm:$0xff] }
 0x13b   : > { %v1221_v47 = vadd.f32 %v1178_v16, %v2326_v30  ;;  %v1222_v50 = vadd.f32 %v1180_v41, %v2329_v32  ;;  %v1123_v48 = vpop.f32.mrf.mxu0  ;;  %v1189_v49 = vrot.slane %v2391_v37, 4  ;;  %v2404_v51 = vadd.f32 %v1000_v24, %v2323_v8  ;;  %v1281_v16 = vld [vmem:[%s2543_s3 + $0x48] sm:$0xff] }
 0x13c   : > { %v1315_v44 = vsel %vm1304_vm6, %v1291_v40, -inf  ;;  %v1184_v53 = vsel %vm1167_vm5, %v1181_v60, %v1183_v38  ;;  %v1185_v5 = vrot.slane %v1123_v48, 4  ;;  %v1309_v6 = vmax.f32 %v1307_v22, %v1308_v42  ;;  %v1280_v40 = vld [vmem:[%s2543_s3 + $0x40] sm:$0xff] }
 0x13d   : > { %v1316_v10 = vmax.f32 %v1314_v14, %v1315_v44  ;;  %v1244_v30 = vadd.f32 %v2320_v26, %v1221_v47  ;;  %v2407_v32 = vpop.f32.mrf.mxu0  ;;  %v1245_v58 = vadd.f32 %v2320_v26, %v1222_v50  ;;  %v1224_v60 = vadd.f32 %v1184_v53, %v2339_v36 }
 0x13e   : > { %v1190_v55 = vsel %vm1167_vm5, %v1187_v21, %v1189_v49  ;;  %v1186_v4 = vsel %vm1167_vm5, %v1183_v38, %v1185_v5  ;;  %v1310_v8 = vrot.slane %v1309_v6, 2  ;;  %v1294_v59 = vmul.f32 %v1278_v1, %v1262_v46 }
 0x13f   : > { %v1317_v57 = vrot.slane %v1316_v10, 4  ;;  %v1260_v13 = vmax.f32 %v1244_v30, 0.0  ;;  %v1261_v63 = vmax.f32 %v1245_v58, 0.0  ;;  %v1247_v7 = vadd.f32 %v2320_v26, %v1224_v60  ;;  %v1136_v20 = vpop.f32.mrf.mxu0 }
 0x140   : > { %v1227_v2 = vadd.f32 %v1190_v55, %v2341_v27  ;;  %v1188_v36 = vsel %vm1167_vm5, %v1185_v5, %v1187_v21  ;;  %v1311_v3 = vmax.f32 %v1309_v6, %v1310_v8  ;;  %v1225_v19 = vadd.f32 %v1186_v4, %v2347_v45 }
 0x141   : > { %v1318_v14 = vmax.f32 %v1316_v10, %v1317_v57  ;;  %v1292_v15 = vmul.f32 %v1276_v39, %v1260_v13  ;;  %v1293_v0 = vmul.f32 %v1277_v56, %v1261_v63  ;;  %v1263_v25 = vmax.f32 %v1247_v7, 0.0  ;;  %v1808_v41 = vpop.f32.mrf.mxu0 }
 0x142   : > { %v1250_v43 = vadd.f32 %v2320_v26, %v1227_v2  ;;  %v1226_v12 = vadd.f32 %v1188_v36, %v2349_v52  ;;  %v1312_v62 = vrot.slane %v1311_v3, 1  ;;  %v1248_v33 = vadd.f32 %v2320_v26, %v1225_v19 }
 0x143   : > { %v1319_v27 = vrot.slane %v1318_v14, 2  ;;  %v1323_v61 = vsel %vm1304_vm6, %v1292_v15, -inf  ;;  %v1324_v45 = vsel %vm1304_vm6, %v1293_v0, -inf  ;;  %v1295_v35 = vmul.f32 %v1279_v9, %v1263_v25  ;;  %v1139_v55 = vpop.f32.mrf.mxu0 }
 0x144   : > { %v1266_v31 = vmax.f32 %v1250_v43, 0.0  ;;  %v1249_v21 = vadd.f32 %v2320_v26, %v1226_v12  ;;  %v1313_v22 = vmax.f32 %v1311_v3, %v1312_v62  ;;  %v1325_v52 = vmax.f32 %v1323_v61, %v1324_v45  ;;  %v1287_v45 = vld [vmem:[%s2543_s3 + $0x78] sm:$0xff] }
 0x145   : > { %v1320_v34 = vmax.f32 %v1318_v14, %v1319_v27  ;;  %v1264_v24 = vmax.f32 %v1248_v33, 0.0  ;;  %v1332_v38 = vsel %vm1304_vm6, %v1294_v59, -inf  ;;  %v1333_v42 = vsel %vm1304_vm6, %v1295_v35, -inf  ;;  %v1286_v33 = vld [vmem:[%s2543_s3 + $0x70] sm:$0xff] }
 0x146   : > { %v1298_v46 = vmul.f32 %v1282_v28, %v1266_v31  ;;  %v1265_v47 = vmax.f32 %v1249_v21, 0.0  ;;  %v1377_v50 = vpack.c.bf16 %v1313_v22, %v1313_v22  ;;  %v1326_v44 = vrot.slane %v1325_v52, 4 }
 0x147   : > { %v1321_v48 = vrot.slane %v1320_v34, 1  ;;  %v1334_v1 = vmax.f32 %v1332_v38, %v1333_v42  ;;  %v1296_v53 = vmul.f32 %v1280_v40, %v1264_v24  ;;  %v1195_v6 = vrot.slane %v2407_v32, 4 }
 0x148   : > { %v1297_v5 = vmul.f32 %v1281_v16, %v1265_v47  ;;  %v1191_v10 = vrot.slane %v1136_v20, 4  ;;  %v1406_v30 = vunpack.c.l.b16 %v1377_v50  ;;  %v1327_v39 = vmax.f32 %v1325_v52, %v1326_v44 }
 0x149   : > { %v1322_v58 = vmax.f32 %v1320_v34, %v1321_v48  ;;  %v1335_v60 = vrot.slane %v1334_v1, 4  ;;  %v1341_v4 = vsel %vm1304_vm6, %v1296_v53, -inf  ;;  %v1197_v59 = vrot.slane %v1808_v41, 4  ;;  %v1284_v48 = vld [vmem:[%s2543_s3 + $0x60] sm:$0xff] }
 0x14a   : > { %v1342_v8 = vsel %vm1304_vm6, %v1297_v5, -inf  ;;  %v1192_v57 = vsel %vm1167_vm5, %v1189_v49, %v1191_v10  ;;  %v1328_v56 = vrot.slane %v1327_v39, 2  ;;  %v1193_v3 = vrot.slane %v1139_v55, 4 }
 0x14b   : > { %v1378_v13 = vpack.c.bf16 %v1322_v58, %v1322_v58  ;;  %v1336_v63 = vmax.f32 %v1334_v1, %v1335_v60  ;;  %v1343_v7 = vmax.f32 %v1341_v4, %v1342_v8  ;;  %v1228_v32 = vadd.f32 %v1192_v57, %v2369_v11 }
 0x14c   : > { %v1198_v2 = vsel %vm1167_vm5, %v1195_v6, %v1197_v59  ;;  %v1216_v36 = vsel %vm1167_vm5, %v1197_v59, %v1168_v18  ;;  %v1329_v15 = vmax.f32 %v1327_v39, %v1328_v56  ;;  %v1194_v0 = vsel %vm1167_vm5, %v1191_v10, %v1193_v3  ;;  %v1283_v18 = vld [vmem:[%s2543_s3 + $0x58] sm:$0xff] }
 0x14d   : > { %v1407_v14 = vunpack.c.l.b16 %v1378_v13  ;;  %v1337_v37 = vrot.slane %v1336_v63, 2  ;;  %v1344_v9 = vrot.slane %v1343_v7, 4  ;;  %v1251_v49 = vadd.f32 %v2320_v26, %v1228_v32 }
 0x14e   : > { %v1231_v19 = vadd.f32 %v1198_v2, %v2372_v17  ;;  %v1232_v20 = vadd.f32 %v1216_v36, %v2381_v23  ;;  %v1330_v25 = vrot.slane %v1329_v15, 1  ;;  %v1196_v17 = vsel %vm1167_vm5, %v1193_v3, %v1195_v6 }
 0x14f   : > { %v1415_v11 = vsel %vm1414_vm7, %v1407_v14, %v1406_v30  ;;  %v1338_v43 = vmax.f32 %v1336_v63, %v1337_v37  ;;  %v1345_v54 = vmax.f32 %v1343_v7, %v1344_v9  ;;  %v1267_v12 = vmax.f32 %v1251_v49, 0.0 }
 0x150   : > { %v1254_v62 = vadd.f32 %v2320_v26, %v1231_v19  ;;  %v1255_v27 = vadd.f32 %v2320_v26, %v1232_v20  ;;  %v1331_v61 = vmax.f32 %v1329_v15, %v1330_v25  ;;  %v1350_v28 = vsel %vm1304_vm6, %v1298_v46, -inf }
 0x151   : > { %v1339_v23 = vrot.slane %v1338_v43, 1  ;;  %v1229_v35 = vadd.f32 %v1194_v0, %v2389_v29  ;;  %v1299_v31 = vmul.f32 %v1283_v18, %v1267_v12  ;;  %v1230_v34 = vadd.f32 %v1196_v17, %v2404_v51  ;;  %v1285_v51 = vld [vmem:[%s2543_s3 + $0x68] sm:$0xff] }
 0x152   : > { %v1270_v21 = vmax.f32 %v1254_v62, 0.0  ;;  %v1271_v22 = vmax.f32 %v1255_v27, 0.0  ;;  %v1379_v52 = vpack.c.bf16 %v1331_v61, %v1331_v61  ;;  %v1346_v40 = vrot.slane %v1345_v54, 2 }
 0x153   : > { %v1340_v24 = vmax.f32 %v1338_v43, %v1339_v23  ;;  %v1252_v16 = vadd.f32 %v2320_v26, %v1229_v35  ;;  %v1351_v41 = vsel %vm1304_vm6, %v1299_v31, -inf  ;;  %v1253_v46 = vadd.f32 %v2320_v26, %v1230_v34  ;;  %v1645_v31 = vld [vmem:[%s2545_s5] ss:$0 sm:$0xff] }
 0x154   : > { %v1302_v38 = vmul.f32 %v1286_v33, %v1270_v21  ;;  %v1303_v42 = vmul.f32 %v1287_v45, %v1271_v22  ;;  %v1408_v47 = vunpack.c.l.b16 %v1379_v52  ;;  %v1352_v29 = vmax.f32 %v1350_v28, %v1351_v41 }
 0x155   : > { %v1380_v50 = vpack.c.bf16 %v1340_v24, %v1340_v24  ;;  %v1268_v53 = vmax.f32 %v1252_v16, 0.0  ;;  %v1269_v5 = vmax.f32 %v1253_v46, 0.0  ;;  %v1347_v10 = vmax.f32 %v1345_v54, %v1346_v40 }
 0x156   : > { %v1368_v44 = vsel %vm1304_vm6, %v1302_v38, -inf  ;;  %v1369_v1 = vsel %vm1304_vm6, %v1303_v42, -inf  ;;  %v1417_v26 = vsel %vm1416_vm8, %v1408_v47, %v1415_v11  ;;  %v1353_v30 = vrot.slane %v1352_v29, 4 }
 0x157   : > { %v1409_v6 = vunpack.c.l.b16 %v1380_v50  ;;  %v1370_v58 = vmax.f32 %v1368_v44, %v1369_v1  ;;  %v1300_v39 = vmul.f32 %v1284_v48, %v1268_v53  ;;  %v1301_v60 = vmul.f32 %v1285_v51, %v1269_v5 }
 0x158   : > { %v1354_v4 = vmax.f32 %v1352_v29, %v1353_v30  ;;  %v1348_v13 = vrot.slane %v1347_v10, 1 }
 0x159   : > { %v1419_v55 = vsel %vm1418_vm9, %v1409_v6, %v1417_v26  ;;  %v1371_v8 = vrot.slane %v1370_v58, 4  ;;  %v1359_v57 = vsel %vm1304_vm6, %v1300_v39, -inf  ;;  %v1360_v59 = vsel %vm1304_vm6, %v1301_v60, -inf }
 0x15a   : > { %v1355_v56 = vrot.slane %v1354_v4, 2  ;;  %v1361_v63 = vmax.f32 %v1359_v57, %v1360_v59  ;;  %v1349_v3 = vmax.f32 %v1347_v10, %v1348_v13 }
 0x15b   : > { %v1372_v7 = vmax.f32 %v1370_v58, %v1371_v8 }
 0x15c   : > { %v1356_v32 = vmax.f32 %v1354_v4, %v1355_v56  ;;  %v1362_v2 = vrot.slane %v1361_v63, 4  ;;  %v1381_v20 = vpack.c.bf16 %v1349_v3, %v1349_v3 }
 0x15d   : > { %v1373_v36 = vrot.slane %v1372_v7, 2 }
 0x15e   : > { %v1357_v14 = vrot.slane %v1356_v32, 1  ;;  %v1363_v15 = vmax.f32 %v1361_v63, %v1362_v2  ;;  %v1410_v54 = vunpack.c.l.b16 %v1381_v20 }
 0x15f   : > { %v1374_v37 = vmax.f32 %v1372_v7, %v1373_v36 }
 0x160   : > { %v1358_v9 = vmax.f32 %v1356_v32, %v1357_v14  ;;  %v1364_v49 = vrot.slane %v1363_v15, 2  ;;  %v1421_v61 = vsel %vm1420_vm10, %v1410_v54, %v1419_v55 }
 0x161   : > { %v1375_v19 = vrot.slane %v1374_v37, 1 }
 0x162   : > { %v1365_v0 = vmax.f32 %v1363_v15, %v1364_v49  ;;  %v1382_v11 = vpack.c.bf16 %v1358_v9, %v1358_v9 }
 0x163   : > { %v1376_v25 = vmax.f32 %v1374_v37, %v1375_v19 }
 0x164   : > { %v1366_v43 = vrot.slane %v1365_v0, 1  ;;  %v1411_v12 = vunpack.c.l.b16 %v1382_v11 }
 0x165   : > { %v1384_v62 = vpack.c.bf16 %v1376_v25, %v1376_v25 }
 0x166   : > { %v1367_v18 = vmax.f32 %v1365_v0, %v1366_v43  ;;  %v1423_v28 = vsel %vm1422_vm11, %v1411_v12, %v1421_v61 }
 0x167   : > { %v1413_v23 = vunpack.c.l.b16 %v1384_v62 }
 0x168   : > { %v1383_v27 = vpack.c.bf16 %v1367_v18, %v1367_v18 }
 0x16a   : > { %v1412_v17 = vunpack.c.l.b16 %v1383_v27 }
 0x16c   : > { %v1425_v33 = vsel %vm1424_vm12, %v1412_v17, %v1423_v28 }
 0x16d   : > { %v1427_v45 = vsel %vm1426_vm13, %v1413_v23, %v1425_v33 }
 0x16e   : > { %v1428_v35 = vpack.c.b16 %v1427_v45, %v1427_v45 }
 0x170   : > { %1816 = vmatmul.mubr.msk.bf16.vlgmr.msra.gmra.mxu1 %vm1304_vm6, %v1428_v35 }
 0x230   : > { %v1484_v21 = vpop.f32.mrf.mxu1 }
 0x231   : > { %v1485_v22 = vadd.f32 %v1645_v31, %v1484_v21 }
 0x232   : > { %v1817_v34 = vpop.f32.mrf.mxu1 }
 0x233   : > { %1490 = vst [vmem:[%s262_s28] sm:$0xff] %v1485_v22 }
 0x234   : > { %v1487_v52 = vpop.f32.mrf.mxu1 }
 0x235   : > { %1937 = shalt.err (!%p1934_p0)
}
 0x236   : > { %s1938_s16 = scalar_lea.hbm %s2499_s11, 128  ;;  %s1942_s19 = scalar_lea.hbm %s2546_s6, 256 }
 0x237   : > { %p1939_p1 = scmp.ne.s32.totalorder %s2499_s11, %s1938_s16  ;;  %p1943_p4 = scmp.lt.s32.totalorder %s2499_s11, %s2546_s6 }
 0x238   : > { %p1944_p7 = scmp.lt.s32.totalorder %s1942_s19, %s1938_s16 }
 0x239   : > { %p1940_p2 = pnand %p1939_p1, %p2069_p5 }
 0x23a   : > { %p1945_p8 = por %p1944_p7, %p1943_p4 }
 0x23b   : > { %p1941_p3 = pneg %p1940_p2 }
 0x23d   : > { %p1946_p6 = pnand %p1945_p8, %p1941_p3 }
 0x23f   : > { %1949 = shalt.err (!%p1946_p6)
}
 0x240   : > { %1827 = dma.vmem_to_hbm [thread:$0]  (%p2069_p5), %s2501_s29, 128, %s2499_s11, %s1492_s12   ;;  %v1818_v24 = vpop.f32.mrf.mxu1 }
 0x241 PF: > { %p1839_p9 = scmp.ge.s32.totalorder %s1988_s24, 2  ;;  %s1517_s28 = sand.u32 1, %s1976_s21  }
 0x242   : > { %p2550_p10 = scmp.ne.s32.totalorder %s2548_s8, 0  ;;  %s1518_s9 = scalar_lea.sflag [#allocation4], %s1517_s28 }
 0x244   : > { %p1834_p11 = pnand %p1839_p9, %p2550_p10 }
 0x246   : > { %p1835_p12 = pneg %p1834_p11 }
 0x248   : > { %1971 = dma.done.wait (%p1835_p12), %s1518_s9, 128  }
 0x249   : > { %1973 = vsyncadd (%p1835_p12), %s1518_s9, 4294967168  ;;  %p17_p13 = scmp.ge.s32.totalorder %s2056_s27, 4   ;;  %s2551_s21 = smov %s1980_s22 }
 0x24a   : > { %s2552_s22 = smov %s1984_s23  ;;  %s2553_s23 = smov %s2067_s30 }
 0x24b   : > { %s2554_s24 = smov %s2056_s27  ;;  %19 = sbr.rel (!%p17_p13) target bundleno = 4 (0x4), region = 88 }
 0x250   :  { %1523 = vsyncpa [#allocation3], 1 }
 0x251   :  { %1525 = vsyncpa [#allocation3 + $0x1], 1 }
 0x252   :  { %1526 = vsyncpa [#allocation4], 1 }
 0x253   :  { %1528 = vsyncpa [#allocation4 + $0x1], 1 }

</bundles_post_ra>
